<compile_context>
chip_gen: v7x
topology: tpu7x:2x2x1
jax: 0.10.0
libtpu: 0.0.40
codegen_flags: <defaults>
</compile_context>

<pallas_src>
import functools

import jax
import jax.numpy as jnp
from jax import lax
from jax.experimental import pallas as pl
from jax.experimental.pallas import tpu as pltpu


def _bilinear_matrix(out_size: int, in_size: int) -> jnp.ndarray:
    """Dense (out_size, in_size) 1-D bilinear interpolation matrix,
    align_corners=False (matches PyTorch F.upsample/interpolate default)."""
    dst = jnp.arange(out_size, dtype=jnp.float32)
    scale = in_size / out_size
    src = (dst + 0.5) * scale - 0.5
    src = jnp.maximum(src, 0.0)                      # PyTorch clamps negative coords to 0
    i0 = jnp.floor(src).astype(jnp.int32)
    i0 = jnp.minimum(i0, in_size - 1)
    i1 = jnp.minimum(i0 + 1, in_size - 1)
    w1 = src - i0.astype(jnp.float32)
    w0 = 1.0 - w1
    oh0 = jax.nn.one_hot(i0, in_size, dtype=jnp.float32)
    oh1 = jax.nn.one_hot(i1, in_size, dtype=jnp.float32)
    return w0[:, None] * oh0 + w1[:, None] * oh1     # handles i0 == i1 correctly


def _upsample_kernel(ah_ref, awt_ref, x_ref, o_ref):
    # ah_ref : (H_out, H_in)      awt_ref : (W_in, W_out)
    # x_ref  : (B, H_in, W_in)    o_ref   : (B, H_out, W_out)
    b = x_ref.shape[0]
    x = x_ref[...]
    # Broadcast the tiny interpolation matrices across the image batch (VMEM-local).
    awt_b = jnp.broadcast_to(awt_ref[...], (b,) + tuple(awt_ref.shape))
    ah_b = jnp.broadcast_to(ah_ref[...], (b,) + tuple(ah_ref.shape))
    # W-contraction: (B,H_in,W_in) x (B,W_in,W_out) -> (B,H_in,W_out), f32 accumulate.
    t = lax.dot_general(
        x, awt_b,
        dimension_numbers=(((2,), (1,)), ((0,), (0,))),
        preferred_element_type=jnp.float32,
    )
    t = t.astype(x.dtype)
    # H-contraction: (B,H_out,H_in) x (B,H_in,W_out) -> (B,H_out,W_out), f32 accumulate.
    o = lax.dot_general(
        ah_b, t,
        dimension_numbers=(((2,), (1,)), ((0,), (0,))),
        preferred_element_type=jnp.float32,
    )
    o_ref[...] = o.astype(o_ref.dtype)


def _choose_batch(nc, h_in, w_in, h_out, w_out, itemsize):
    """Images per grid step: ~2 MiB of in+out per step, capped so the broadcast
    interp matrices stay small and so v7x's two TensorCores both get >= 1 step."""
    per_image = (h_in * w_in + h_out * w_out) * itemsize
    b = max(1, min(256, (2 * 1024 * 1024) // max(1, per_image)))
    mat_per_image = (h_out * h_in + w_in * w_out) * itemsize
    b = max(1, min(b, (4 * 1024 * 1024) // max(1, mat_per_image)))
    if nc >= 2:                      # keep >= 2 grid steps when there is enough work
        b = min(b, -(-nc // 2))
    return max(1, min(b, nc))


@functools.partial(jax.jit, static_argnums=(1, 2))
def bilinear_upsample(x: jnp.ndarray, out_h: int, out_w: int) -> jnp.ndarray:
    """x: (N, C, H_in, W_in) -> (N, C, out_h, out_w), bilinear, align_corners=False."""
    n, c, h_in, w_in = x.shape
    nc = n * c
    dtype = x.dtype

    a_h = _bilinear_matrix(out_h, h_in).astype(dtype)        # (H_out, H_in)
    a_w_t = _bilinear_matrix(out_w, w_in).astype(dtype).T    # (W_in, W_out)

    b = _choose_batch(nc, h_in, w_in, out_h, out_w, x.dtype.itemsize)
    num_blocks = -(-nc // b)
    nc_pad = num_blocks * b

    x_flat = x.reshape(nc, h_in, w_in)
    if nc_pad != nc:
        x_flat = jnp.pad(x_flat, ((0, nc_pad - nc), (0, 0), (0, 0)))

    flops = 2 * nc_pad * (h_in * w_in * out_w + out_h * h_in * out_w)
    bytes_accessed = ((nc_pad * (h_in * w_in + out_h * out_w))
                      + a_h.size + a_w_t.size) * x.dtype.itemsize
    cost = pl.CostEstimate(flops=int(flops), transcendentals=0,
                           bytes_accessed=int(bytes_accessed))

    out = pl.pallas_call(
        _upsample_kernel,
        out_shape=jax.ShapeDtypeStruct((nc_pad, out_h, out_w), dtype),
        grid_spec=pltpu.PrefetchScalarGridSpec(
            num_scalar_prefetch=0,
            grid=(num_blocks,),
            in_specs=[
                pl.BlockSpec((out_h, h_in), lambda i: (0, 0)),        # A_h   (grid-invariant)
                pl.BlockSpec((w_in, out_w), lambda i: (0, 0)),        # A_w^T (grid-invariant)
                pl.BlockSpec((b, h_in, w_in), lambda i: (i, 0, 0)),   # image batch (contiguous)
            ],
            out_specs=pl.BlockSpec((b, out_h, out_w), lambda i: (i, 0, 0)),
        ),
        compiler_params=pltpu.CompilerParams(
            dimension_semantics=("parallel",),
        ),
        cost_estimate=cost,
    )(a_h, a_w_t, x_flat)

    return out[:nc].reshape(n, c, out_h, out_w)


def oct_up_size(x1, x2):
    """Pallas equivalent of OctUp_size.forward.

    x1 = (h, l): tensors to upsample, NCHW.
    x2 = (h_ref, l_ref): tensors whose spatial sizes are the targets, NCHW.
    """
    h, l = x1
    h_out = bilinear_upsample(h, x2[0].shape[2], x2[0].shape[3])
    l_out = bilinear_upsample(l, x2[1].shape[2], x2[1].shape[3])
    return (h_out, l_out)


def _ref_bilinear(x, out_h, out_w):
    """Pure-JAX reference with identical semantics (sanity check)."""
    a_h = _bilinear_matrix(out_h, x.shape[2])
    a_w = _bilinear_matrix(out_w, x.shape[3])
    return jnp.einsum("oh,nchw,pw->ncop", a_h, x, a_w)


if __name__ == "__main__":
    key = jax.random.PRNGKey(0)
    k1, k2 = jax.random.split(key)

    # Octave-conv style pair: high-frequency branch and half-resolution low branch.
    h = jax.random.normal(k1, (2, 4, 8, 8), dtype=jnp.float32)
    l = jax.random.normal(k2, (2, 4, 4, 4), dtype=jnp.float32)
    # x2 only provides target spatial sizes.
    h_tgt = jnp.zeros((2, 4, 16, 16), dtype=jnp.float32)
    l_tgt = jnp.zeros((2, 4, 8, 8), dtype=jnp.float32)

    h_out, l_out = oct_up_size((h, l), (h_tgt, l_tgt))
    jax.block_until_ready(h_out)
    jax.block_until_ready(l_out)

    assert h_out.shape == (2, 4, 16, 16) and l_out.shape == (2, 4, 8, 8)

    # Numerical sanity check against the pure-JAX reference.
    h_ref = _ref_bilinear(h, 16, 16)
    l_ref = _ref_bilinear(l, 8, 8)
    assert jnp.allclose(h_out, h_ref, atol=1e-5, rtol=1e-5)
    assert jnp.allclose(l_out, l_ref, atol=1e-5, rtol=1e-5)

    print("KERNEL_OK")
</pallas_src>

<mosaic_0001>
module attributes {stable_mosaic.version = 11 : i64} {
  func.func @_upsample_kernel(%arg0: i32, %arg1: memref<16x8xf32, #tpu.memory_space<vmem>>, %arg2: memref<8x16xf32, #tpu.memory_space<vmem>>, %arg3: memref<4x8x8xf32, #tpu.memory_space<vmem>>, %arg4: memref<4x16x16xf32, #tpu.memory_space<vmem>>) attributes {dimension_semantics = [#tpu.dimension_semantics<parallel>], iteration_bounds = array<i64: 2>, scalar_prefetch = 0 : i64, scratch_operands = 0 : i64, tpu.core_type = #tpu.core_type<tc>, window_params = [{pipeline_mode = #tpu.pipeline_mode<synchronous>, transform_indices = @transform_0, window_bounds = array<i64: 16, 8>}, {pipeline_mode = #tpu.pipeline_mode<synchronous>, transform_indices = @transform_1, window_bounds = array<i64: 8, 16>}, {transform_indices = @transform_2, window_bounds = array<i64: 4, 8, 8>}, {transform_indices = @transform_3, window_bounds = array<i64: 4, 16, 16>}]} {
    %c0 = arith.constant 0 : index
    %c0_0 = arith.constant 0 : index
    %c0_1 = arith.constant 0 : index
    %0 = vector.load %arg3[%c0, %c0_0, %c0_1] : memref<4x8x8xf32, #tpu.memory_space<vmem>>, vector<4x8x8xf32>
    %c0_2 = arith.constant 0 : index
    %c0_3 = arith.constant 0 : index
    %1 = vector.load %arg2[%c0_2, %c0_3] : memref<8x16xf32, #tpu.memory_space<vmem>>, vector<8x16xf32>
    %2 = vector.shape_cast %1 : vector<8x16xf32> to vector<1x8x16xf32>
    %3 = vector.broadcast %2 : vector<1x8x16xf32> to vector<4x8x16xf32>
    %c0_4 = arith.constant 0 : index
    %c0_5 = arith.constant 0 : index
    %4 = vector.load %arg1[%c0_4, %c0_5] : memref<16x8xf32, #tpu.memory_space<vmem>>, vector<16x8xf32>
    %5 = vector.shape_cast %4 : vector<16x8xf32> to vector<1x16x8xf32>
    %6 = vector.broadcast %5 : vector<1x16x8xf32> to vector<4x16x8xf32>
    %cst = arith.constant dense<0.000000e+00> : vector<4x8x16xf32>
    %7 = tpu.matmul %0, %3, %cst {dimension_numbers = #tpu.dot_dimension_numbers<[2], [1], [1], [2], [0, 0, 0, 1, 1, 2], [0], [0]>} : vector<4x8x8xf32>, vector<4x8x16xf32>, vector<4x8x16xf32> -> vector<4x8x16xf32>
    %cst_6 = arith.constant dense<0.000000e+00> : vector<4x16x16xf32>
    %8 = tpu.matmul %6, %7, %cst_6 {dimension_numbers = #tpu.dot_dimension_numbers<[2], [1], [1], [2], [0, 0, 0, 1, 1, 2], [0], [0]>} : vector<4x16x8xf32>, vector<4x8x16xf32>, vector<4x16x16xf32> -> vector<4x16x16xf32>
    %c0_7 = arith.constant 0 : index
    %c0_8 = arith.constant 0 : index
    %c0_9 = arith.constant 0 : index
    %9 = vector.load %arg4[%c0_7, %c0_8, %c0_9] : memref<4x16x16xf32, #tpu.memory_space<vmem>>, vector<4x16x16xf32>
    tpu.vector_store %arg4[%c0_7, %c0_8, %c0_9], %8 {strides = array<i32>} : memref<4x16x16xf32, #tpu.memory_space<vmem>>, vector<4x16x16xf32>,
    return
  }
  func.func @transform_0(%arg0: i32) -> (i32, i32) {
    %c0_i32 = arith.constant 0 : i32
    %c0_i32_0 = arith.constant 0 : i32
    %c0_i32_1 = arith.constant 0 : i32
    return %c0_i32, %c0_i32_0 : i32, i32
  }
  func.func @transform_1(%arg0: i32) -> (i32, i32) {
    %c0_i32 = arith.constant 0 : i32
    %c0_i32_0 = arith.constant 0 : i32
    %c0_i32_1 = arith.constant 0 : i32
    return %c0_i32, %c0_i32_0 : i32, i32
  }
  func.func @transform_2(%arg0: i32) -> (i32, i32, i32) {
    %c0_i32 = arith.constant 0 : i32
    %c0_i32_0 = arith.constant 0 : i32
    %c0_i32_1 = arith.constant 0 : i32
    return %arg0, %c0_i32, %c0_i32_0 : i32, i32, i32
  }
  func.func @transform_3(%arg0: i32) -> (i32, i32, i32) {
    %c0_i32 = arith.constant 0 : i32
    %c0_i32_0 = arith.constant 0 : i32
    %c0_i32_1 = arith.constant 0 : i32
    return %arg0, %c0_i32, %c0_i32_0 : i32, i32, i32
  }
}

</mosaic_0001>

<bundles_post_ra>
// kernel: bilinear_upsample.1
= control target key start
LH: loop header
LB: loop body
LE: loop exit
PB: predicated region body
PF: predicated region fallthrough
CT: control target
= control target key end

     0   :  { %8 = vsyncpa [#allocation3], 0  ;;  %s1358_s0 = inlined_call_operand.vmem [shape: f32[16,8], index: 0, kind: input, shape index: {}]   ;;  %s1359_s1 = inlined_call_operand.vmem [shape: f32[8,16], index: 1, kind: input, shape index: {}]   ;;  %s1360_s2 = inlined_call_operand.hbm [shape: f32[8,8,8], index: 2, kind: input, shape index: {}]   ;;  %s1361_s3 = inlined_call_operand.hbm [shape: f32[8,16,16], index: 3, kind: output, shape index: {}]  }
   0x1   :  { %10 = vsyncpa [#allocation3 + $0x1], 0 }
   0x2   :  { %11 = vsyncpa [#allocation4], 0 }
   0x3   :  { %13 = vsyncpa [#allocation4 + $0x1], 0  ;;  %s1162_s12 = smov 0   ;;  %s1164_s13 = smov 0  }
   0x4   :  { %s1166_s14 = smov 0   ;;  %s1168_s15 = smov 0  }
   0x5 LB: > { %s1183_s16 = sadd.s32 4294967295, %s1132_s15   ;;  %s894_s17 = sadd.s32 4294967294, %s1132_s15   ;;  %s1132_s15 = sphi %s1168_s15, %s1374_s15   ;;  %s1128_s14 = sphi %s1166_s14, %s1373_s14   ;;  %s1124_s13 = sphi %s1164_s13, %s1372_s13   ;;  %s1120_s12 = sphi %s1162_s12, %s1371_s12  }
   0x6   : > { %s1187_s18 = sadd.s32 1, %s1132_s15   ;;  %s68_s19 = sadd.s32 1, %s1128_s14 }
   0x7   : > { %s65_s20 = ssub.s32 %s1132_s15, %s1187_s18  ;;  %p75_p0 = scmp.ne.s32.totalorder %s1128_s14, %s1124_s13 }
   0x8   : > { %p66_p1 = scmp.eq.s32.totalorder %s65_s20, 0  ;;  %p76_p2 = scmp.eq.s32.totalorder %s1132_s15, 0 }
   0x9   : > { %p81_p3 = scmp.ne.s32.totalorder %s1124_s13, %s1120_s12  ;;  %p82_p4 = scmp.eq.s32.totalorder %s1183_s16, 0 }
   0xa   : > { %s1199_s21 = scalar_select %p66_p1, %s1128_s14, %s68_s19  }
   0xb   : > { %p1201_p5 = por %p76_p2, %p75_p0  ;;  %p1205_p6 = por %p82_p4, %p81_p3 }
   0xc   : > { %p105_p7 = scmp.eq.s32.totalorder %s1183_s16, 1  ;;  %p111_p8 = scmp.eq.s32.totalorder %s894_s17, 1 }
   0xd   : > { %p996_p10 = scmp.lt.s32.totalorder %s1132_s15, 2  ;;  %s137_s26 = sand.u32 1, %s1128_s14  }
   0xe   : > { %p1212_p11 = por %p105_p7, %p75_p0  ;;  %p1216_p12 = por %p111_p8, %p81_p3 }
   0xf   : > { %s921_s27 = sshll.u32 %s1132_s15, 9  ;;  %s897_s28 = sshll.u32 %s137_s26, 5 }
  0x10   : > { %s1365_s24 = scalar_select %p1212_p11, 1, 0 }
  0x11   : > { %s1366_s25 = scalar_select %p1216_p12, 1, 0 }
  0x12   : > { %s1225_s4 = scalar_lea.hbm %s1360_s2, %s921_s27  ;;  %s141_s5 = scalar_lea.vmem [#allocation2], %s897_s28 }
  0x13   : > { %s148_s6 = sshll.u32 %s141_s5, 4  ;;  %p1229_p13 = pnand %p996_p10, %p1201_p5  ;;  %s1233_s6 = int_to_ptr.vmem [resolvable:$true] %s148_s6 }
  0x14   : > { %s1235_s8 = scalar_lea.sflag [#allocation3], %s137_s26  ;;  %s1036_s9 = scalar_lea.hbm %s1225_s4, 512 }
  0x15   : > { %p1037_p0 = scmp.ne.s32.totalorder %s1225_s4, %s1036_s9  ;;  %p1038_p1 = pneg %p1229_p13 }
  0x16   : > { %s1041_s17 = scalar_lea.hbm %s1360_s2, 1024  ;;  %p1042_p4 = scmp.lt.u32.totalorder %s1225_s4, %s1360_s2 }
  0x17   : > { %p1039_p2 = pnand %p1038_p1, %p1037_p0  ;;  %p1043_p5 = scmp.lt.u32.totalorder %s1041_s17, %s1036_s9 }
  0x18   : > { %p1045_p8 = scmp.lt.u32.totalorder %s1036_s9, %s1225_s4 }
  0x19   : > { %p1040_p3 = pneg %p1039_p2  ;;  %p1044_p7 = por %p1043_p5, %p1042_p4 }
  0x1b   : > { %p1046_p10 = por %p1045_p8, %p1044_p7 }
  0x1d   : > { %p1047_p9 = pnand %p1046_p10, %p1040_p3 }
  0x1f   : > { %1050 = shalt.err (!%p1047_p9)
}
  0x20   : > { %s1051_s22 = scalar_lea.vmem %s1233_s6, 512  ;;  %s1134_s26 = smov [#allocation2]  }
  0x21   : > { %p1052_p0 = scmp.ne.s32.totalorder %s1233_s6, %s1051_s22  ;;  %s1056_s27 = sshll.u32 %s1134_s26, 4  ;;  %s1057_s27 = int_to_ptr.vmem [resolvable:$false] %s1056_s27 }
  0x22   : > { %s1058_s28 = scalar_lea.vmem %s1057_s27, 1024  ;;  %p1059_p11 = scmp.lt.s32.totalorder %s1233_s6, %s1057_s27 }
  0x23   : > { %p1054_p2 = pnand %p1052_p0, %p1038_p1  ;;  %p1060_p4 = scmp.lt.s32.totalorder %s1058_s28, %s1051_s22 }
  0x25   : > { %p1055_p12 = pneg %p1054_p2  ;;  %p1061_p5 = por %p1060_p4, %p1059_p11 }
  0x27   : > { %p1062_p7 = pnand %p1061_p5, %p1055_p12 }
  0x29   : > { %1065 = shalt.err (!%p1062_p7)
}
  0x2a   : > { %s1135_s29 = smov 128   ;;  %s1136_s30 = smov 8  }
  0x2b   : > { %991 = dma.hbm_to_vmem [thread:$0]  (!%p1229_p13), %s1225_s4, 512, %s1233_s6, %s1235_s8, %s1135_s29, %s1135_s29, %s1136_s30  }
  0x2c   : > { %p900_p9 = scmp.ge.s32.totalorder %s1132_s15, 1  ;;  %p156_p1 = scmp.lt.s32.totalorder %s1132_s15, 3 }
  0x2e   : > { %p157_p3 = pnand %p900_p9, %p156_p1 }
  0x2f   : > { %s1266_s5 = sand.u32 (!%p157_p3), 1, %s1124_s13  }
  0x30   : > { %160 = sbr.rel (%p157_p3) target bundleno = 506 (0x1fa), region = 32  ;;  %s901_s9 = sshll.u32 (!%p157_p3), %s1266_s5, 5 }
  0x31   : > { %s163_s10 = scalar_lea.sflag (!%p157_p3), [#allocation3], %s1266_s5  ;;  %s166_s11 = scalar_lea.vmem (!%p157_p3), [#allocation2], %s901_s9 }
  0x37   : > { %1111 = dma.done.wait (%p1205_p6), %s163_s10, 512  }
  0x38   : > { %1113 = vsyncadd (%p1205_p6), %s163_s10, 4294966784  ;;  %v1137_v0 = vmov 0.0   ;;  %vm1138_vm0 = vmmov 0   ;;  %vm198_vm1 = vcmask 64512   ;;  %v195_v1 = vld [vmem:[%s1359_s1] sm:$0xff]  ;;  %v192_v3 = vld [vmem:[%s166_s11 + $0x8] sm:$0xff] }
  0x39   : > { %944 = vmatprep.subr.mxu0 %v1137_v0  ;;  %949 = vmatprep.subr.mxu1 %v1137_v0  ;;  %v191_v2 = vld [vmem:[%s166_s11] sm:$0xff]  ;;  %v193_v4 = vld [vmem:[%s166_s11 + $0x10] sm:$0xff]  ;;  %v194_v5 = vld [vmem:[%s166_s11 + $0x18] sm:$0xff]  ;;  %s902_s19 = sshll.u32 %s1266_s5, 6  ;;  %vm797_vm2 = vcmask 130048   ;;  %s923_s26 = sshll.u32 %s1183_s16, 10 }
  0x3a   : > { %946 = vmatprep.mubr.msk.f32.mxu0 %vm1138_vm0, %v1137_v0  ;;  %951 = vmatprep.mubr.msk.f32.mxu1 %vm1138_vm0, %v1137_v0  ;;  %v196_v6 = vld [vmem:[%s1358_s0] sm:$0xff]  ;;  %v197_v9 = vld [vmem:[%s1358_s0 + $0x8] sm:$0xff]  ;;  %s188_s20 = scalar_lea.vmem [#allocation5], %s902_s19  ;;  %s1310_s16 = scalar_lea.hbm %s1361_s3, %s923_s26 }
  0x3b   : > { %945 = vmatpush3.msra.mxu0 %v195_v1  ;;  %950 = vmatpush3.msra.mxu1 %v195_v1  ;;  %s821_s22 = sshll.u32 %s188_s20, 4  ;;  %s807_s29 = scalar_lea.sflag [#allocation4], %s1266_s5  ;;  %s1303_s22 = int_to_ptr.vmem [resolvable:$true] %s821_s22 }
  0x3c   : > { %947 = vmatmul.mubr.msk.f32.vlgmr.msra.gmra.mrb[0].mxu0 %vm198_vm1, %v191_v2  ;;  %952 = vmatmul.mubr.msk.f32.vlgmr.msra.gmra.mrb[0].mxu1 %vm198_vm1, %v192_v3  ;;  %s1066_s30 = scalar_lea.vmem %s1303_s22, 1024  ;;  %p1368_p11 = scmp.ne.s32.totalorder %s1365_s24, 0 }
  0x3d   : > { %954 = vmatprep.subr.mxu0 %v1137_v0  ;;  %959 = vmatprep.subr.mxu1 %v1137_v0  ;;  %p1067_p6 = scmp.ne.s32.totalorder %s1303_s22, %s1066_s30  ;;  %s1139_s9 = smov [#allocation5]  }
  0x3e   : > { %955 = vmatpush3.msra.mxu0 %v195_v1  ;;  %956 = vmatprep.mubr.msk.f32.mxu0 %vm1138_vm0, %v1137_v0  ;;  %s1070_s10 = sshll.u32 %s1139_s9, 4  ;;  %s1071_s10 = int_to_ptr.vmem [resolvable:$false] %s1070_s10 }
  0x3f   : > { %960 = vmatpush3.msra.mxu1 %v195_v1  ;;  %961 = vmatprep.mubr.msk.f32.mxu1 %vm1138_vm0, %v1137_v0  ;;  %p1068_p12 = pnand %p1067_p6, %p1368_p11  ;;  %s1072_s11 = scalar_lea.vmem %s1071_s10, 2048 }
  0x40   : > { %957 = vmatmul.mubr.msk.f32.vlgmr.msra.gmra.mrb[2].mxu0 %vm198_vm1, %v193_v4  ;;  %962 = vmatmul.mubr.msk.f32.vlgmr.msra.gmra.mrb[2].mxu1 %vm198_vm1, %v194_v5  ;;  %p1073_p8 = scmp.lt.s32.totalorder %s1303_s22, %s1071_s10  ;;  %p1074_p10 = scmp.lt.s32.totalorder %s1072_s11, %s1066_s30 }
  0x41   : > { %966 = vmatprep.mubr.msk.f32.mxu0 %vm198_vm1, %v196_v6  ;;  %971 = vmatprep.mubr.msk.f32.mxu1 %vm198_vm1, %v196_v6  ;;  %p1069_p13 = pneg %p1068_p12 }
  0x42   : > { %p1075_p0 = por %p1074_p10, %p1073_p8 }
  0x44   : > { %p1076_p2 = pnand %p1075_p0, %p1069_p13 }
 0x10f   : > { %v268_v7 = vpop.f32.mrb[0].mxu0  ;;  %v341_v8 = vpop.f32.mrb[0].mxu1 }
 0x110   : > { %v948_v10 = vpop.f32.mrb[1].mxu0  ;;  %v953_v11 = vpop.f32.mrb[1].mxu1  ;;  %964 = vmatprep.subr.mxu0 %v268_v7  ;;  %969 = vmatprep.subr.mxu1 %v341_v8 }
 0x111   : > { %965 = vmatpush3.msra.mxu0 %v268_v7  ;;  %970 = vmatpush3.msra.mxu1 %v341_v8 }
 0x112   : > { %967 = vmatmul.mubr.msk.f32.vlgmr.msra.gmra.mrb[4].mxu0 %vm198_vm1, %v197_v9  ;;  %972 = vmatmul.mubr.msk.f32.vlgmr.msra.gmra.mrb[4].mxu1 %vm198_vm1, %v197_v9 }
 0x113   : > { %v414_v12 = vpop.f32.mrb[2].mxu0  ;;  %v487_v13 = vpop.f32.mrb[2].mxu1  ;;  %976 = vmatprep.mubr.msk.f32.mxu0 %vm198_vm1, %v196_v6  ;;  %981 = vmatprep.mubr.msk.f32.mxu1 %vm198_vm1, %v196_v6 }
 0x114   : > { %v958_v14 = vpop.f32.mrb[3].mxu0  ;;  %v963_v15 = vpop.f32.mrb[3].mxu1  ;;  %974 = vmatprep.subr.mxu0 %v414_v12  ;;  %979 = vmatprep.subr.mxu1 %v487_v13 }
 0x115   : > { %975 = vmatpush3.msra.mxu0 %v414_v12  ;;  %980 = vmatpush3.msra.mxu1 %v487_v13 }
 0x116   : > { %977 = vmatmul.mubr.msk.f32.vlgmr.msra.gmra.mrb[6].mxu0 %vm198_vm1, %v197_v9  ;;  %982 = vmatmul.mubr.msk.f32.vlgmr.msra.gmra.mrb[6].mxu1 %vm198_vm1, %v197_v9 }
 0x1e5   : > { %v968_v16 = vpop.f32.mrb[4].mxu0  ;;  %v973_v17 = vpop.f32.mrb[4].mxu1 }
 0x1e6   : > { %799 = vst.msk [vmem:[%s188_s20 + $0x8] sm:$0xff] %vm797_vm2, %v968_v16  ;;  %801 = vst.msk [vmem:[%s188_s20 + $0x18] sm:$0xff] %vm797_vm2, %v973_v17  ;;  %v563_v18 = vpop.f32.mrb[5].mxu0  ;;  %v638_v19 = vpop.f32.mrb[5].mxu1 }
 0x1e7   : > { %798 = vst.msk [vmem:[%s188_s20] sm:$0xff] %vm797_vm2, %v563_v18  ;;  %800 = vst.msk [vmem:[%s188_s20 + $0x10] sm:$0xff] %vm797_vm2, %v638_v19 }
 0x1e9   : > { %v978_v20 = vpop.f32.mrb[6].mxu0  ;;  %v983_v21 = vpop.f32.mrb[6].mxu1 }
 0x1ea   : > { %803 = vst.msk [vmem:[%s188_s20 + $0x28] sm:$0xff] %vm797_vm2, %v978_v20  ;;  %805 = vst.msk [vmem:[%s188_s20 + $0x38] sm:$0xff] %vm797_vm2, %v983_v21  ;;  %v713_v22 = vpop.f32.mrb[7].mxu0  ;;  %v788_v23 = vpop.f32.mrb[7].mxu1 }
 0x1eb   : > { %802 = vst.msk [vmem:[%s188_s20 + $0x20] sm:$0xff] %vm797_vm2, %v713_v22  ;;  %804 = vst.msk [vmem:[%s188_s20 + $0x30] sm:$0xff] %vm797_vm2, %v788_v23 }
 0x1ec   : > { %1079 = shalt.err (!%p1076_p2)
}
 0x1ed   : > { %s1080_s4 = scalar_lea.hbm %s1310_s16, 1024  ;;  %s1084_s7 = scalar_lea.hbm %s1361_s3, 2048 }
 0x1ee   : > { %p1081_p4 = scmp.ne.s32.totalorder %s1310_s16, %s1080_s4  ;;  %p1085_p9 = scmp.lt.u32.totalorder %s1310_s16, %s1361_s3 }
 0x1ef   : > { %p1086_p1 = scmp.lt.u32.totalorder %s1084_s7, %s1080_s4  ;;  %p1088_p6 = scmp.lt.u32.totalorder %s1080_s4, %s1310_s16 }
 0x1f0   : > { %p1082_p5 = pnand %p1081_p4, %p1368_p11 }
 0x1f1   : > { %p1087_p3 = por %p1086_p1, %p1085_p9 }
 0x1f2   : > { %p1083_p7 = pneg %p1082_p5 }
 0x1f3   : > { %p1089_p12 = por %p1088_p6, %p1087_p3 }
 0x1f5   : > { %p1090_p13 = pnand %p1089_p12, %p1083_p7 }
 0x1f7   : > { %1093 = shalt.err (!%p1090_p13)
}
 0x1f8   : > { %s1140_s19 = smov 128   ;;  %s1141_s20 = smov 8  }
 0x1f9   : > { %986 = dma.vmem_to_hbm [thread:$0]  (%p1368_p11), %s1303_s22, 1024, %s1310_s16, %s807_s29, %s1140_s19, %s1140_s19, %s1141_s20  }
 0x1fa PF: > { %s836_s26 = sand.u32 1, %s1120_s12   ;;  %p1369_p8 = scmp.ne.s32.totalorder %s1366_s25, 0 }
 0x1fb   : > { %p1370_p10 = scmp.ge.s32.totalorder %s1132_s15, 2  ;;  %s837_s27 = scalar_lea.sflag [#allocation4], %s836_s26 }
 0x1fd   : > { %p993_p0 = pnand %p1370_p10, %p1369_p8 }
 0x1ff   : > { %1115 = dma.done.wait (!%p993_p0), %s837_s27, 1024  }
 0x200   : > { %1117 = vsyncadd (!%p993_p0), %s837_s27, 4294966272  ;;  %p16_p2 = scmp.ge.s32.totalorder %s1187_s18, 4   ;;  %s1371_s12 = smov %s1124_s13 }
 0x201   : > { %s1372_s13 = smov %s1128_s14  ;;  %s1373_s14 = smov %s1199_s21 }
 0x202   : > { %s1374_s15 = smov %s1187_s18  ;;  %18 = sbr.rel (!%p16_p2) target bundleno = 5 (0x5), region = 77 }
 0x209   :  { %842 = vsyncpa [#allocation3], 1 }
 0x20a   :  { %844 = vsyncpa [#allocation3 + $0x1], 1 }
 0x20b   :  { %845 = vsyncpa [#allocation4], 1 }
 0x20c   :  { %847 = vsyncpa [#allocation4 + $0x1], 1 }

</bundles_post_ra>
